<compile_context>
chip_gen: v6e
topology: v6e:2x2x1
jax: 0.10.0
libtpu: 0.0.40
codegen_flags: <defaults>
</compile_context>

<pallas_src>
import jax
import jax.numpy as jnp
from jax.experimental import pallas as pl
from jax.experimental.pallas import tpu as pltpu


# ---------------------------------------------------------------------------
# Helpers
# ---------------------------------------------------------------------------

def _pick_vmem_limit():
    """~3/4 of physical VMEM: 48 MiB on v7x (64 MiB), 96 MiB on v5e/v6e (128 MiB)."""
    cap = None
    try:
        cap = getattr(pltpu.get_tpu_info(), "vmem_capacity_bytes", None)
    except Exception:
        cap = None
    if not cap:
        cap = 64 * 1024 * 1024          # conservative (v7x-sized) fallback
    return int(cap) * 3 // 4


def _partition(n, block_rows, num_partials):
    """Batch tiling + leading 'parallel' axis (v7x dual-TensorCore split)."""
    tile_rows = n if n <= block_rows else max(16, (block_rows // 16) * 16)
    total_blocks = pl.cdiv(n, tile_rows)
    if num_partials is None:
        num_partials = 2 if total_blocks >= 2 else 1
    num_partials = max(1, min(num_partials, total_blocks))
    blocks_per_partial = pl.cdiv(total_blocks, num_partials)
    return tile_rows, total_blocks, num_partials, blocks_per_partial


def _block_loss_sum(logits, tgt, global_row, *, smoothing, num_classes,
                    n_valid, inv_n):
    """Label-smoothed CE, summed and pre-scaled by 1/N, over one (TN, C) tile.

    Rows with global_row >= n_valid (ragged tail / clamped dummy blocks)
    contribute exactly zero, so no HBM-side padding is needed and the batch
    mean stays unbiased.
    """
    rows = logits.shape[0]
    valid = global_row < n_valid                                   # (TN, 1)
    x = jnp.where(valid, logits, 0.0)                              # garbage-safe

    # Numerically stable log-softmax over the class (lane) axis.
    m = jnp.max(x, axis=1, keepdims=True)
    shifted = x - m
    lse = jnp.log(jnp.sum(jnp.exp(shifted), axis=1, keepdims=True))
    logprobs = shifted - lse                                       # (TN, C)

    # Fused class reduction: loss_i = (1-s)*nll_i + s*mean_c(-logprobs_ic)
    cls = jax.lax.broadcasted_iota(jnp.int32, (rows, num_classes), 1)
    one_hot = (cls == tgt).astype(jnp.float32)
    weights = smoothing / num_classes + (1.0 - smoothing) * one_hot
    per_sample = -jnp.sum(weights * logprobs, axis=1, keepdims=True)  # (TN,1)

    contrib = jnp.where(valid, per_sample * inv_n, 0.0)
    return jnp.sum(contrib, axis=0, keepdims=True)                 # (1, 1)


# ---------------------------------------------------------------------------
# Standalone label-smoothed cross-entropy on precomputed logits
# ---------------------------------------------------------------------------

def _make_lsce_kernel(*, smoothing, num_classes, n_valid, tile_rows,
                      blocks_per_partial):
    inv_n = 1.0 / n_valid

    def kernel(x_ref, tgt_ref, out_ref):
        p = pl.program_id(0)
        k = pl.program_id(1)

        @pl.when(k == 0)
        def _init():
            out_ref[...] = jnp.zeros_like(out_ref)

        row = jax.lax.broadcasted_iota(jnp.int32, (tile_rows, 1), 0)
        global_row = (p * blocks_per_partial + k) * tile_rows + row

        block_sum = _block_loss_sum(
            x_ref[...].astype(jnp.float32), tgt_ref[...], global_row,
            smoothing=smoothing, num_classes=num_classes,
            n_valid=n_valid, inv_n=inv_n)
        out_ref[...] += block_sum      # (1,1) broadcast into resident (8,128)

    return kernel


def label_smoothing_cross_entropy(x, target, smoothing=0.1, *,
                                  block_rows=8192, num_partials=None):
    """x: (N, C) logits (f32 or bf16, native layout); target: (N,) labels."""
    n, c = x.shape
    tile_rows, total_blocks, num_partials, blocks_per_partial = _partition(
        n, block_rows, num_partials)

    tgt = target.astype(jnp.int32).reshape(n, 1)
    kernel = _make_lsce_kernel(smoothing=smoothing, num_classes=c, n_valid=n,
                               tile_rows=tile_rows,
                               blocks_per_partial=blocks_per_partial)

    last_block = total_blocks - 1

    def in_index(p, k):
        # Clamp fully-out-of-range blocks (uneven partial split); their rows
        # are masked to zero inside the kernel.
        return (jnp.minimum(p * blocks_per_partial + k, last_block), 0)

    cost = pl.CostEstimate(
        flops=6 * n * c,
        transcendentals=n * c + n,
        bytes_accessed=n * c * x.dtype.itemsize + n * 4
        + num_partials * 8 * 128 * 4,
    )

    out = pl.pallas_call(
        kernel,
        out_shape=jax.ShapeDtypeStruct((num_partials * 8, 128), jnp.float32),
        grid_spec=pltpu.PrefetchScalarGridSpec(
            num_scalar_prefetch=0,
            grid=(num_partials, blocks_per_partial),
            in_specs=[
                pl.BlockSpec((tile_rows, c), in_index),   # logits, native (N,C)
                pl.BlockSpec((tile_rows, 1), in_index),   # targets
            ],
            out_specs=pl.BlockSpec((8, 128), lambda p, k: (p, 0)),
        ),
        compiler_params=pltpu.CompilerParams(
            dimension_semantics=("parallel", "arbitrary"),
            vmem_limit_bytes=_pick_vmem_limit(),
        ),
        cost_estimate=cost,
    )(x, tgt)

    # Every element of a partial's (8,128) block carries that partial's sum.
    return jnp.sum(out[::8, 0])


# ---------------------------------------------------------------------------
# nn.Linear head forward (the module forward's trainable part)
# ---------------------------------------------------------------------------

def _linear_head_kernel(feat_ref, w_ref, b_ref, out_ref):
    y = jnp.dot(feat_ref[...], w_ref[...], preferred_element_type=jnp.float32)
    out_ref[...] = (y + b_ref[...].astype(jnp.float32)).astype(out_ref.dtype)


def classifier_head(features, weight, bias, *, block_rows=2048):
    """Forward of self.model.head = nn.Linear(num_features, num_classes).
    # TODO(synk): the timm pretrained backbone that produces `features` is a
    # full CNN/ViT and is not re-implemented as a Pallas kernel.
    """
    n, d = features.shape
    c = weight.shape[0]
    tile_rows = n if n <= block_rows else max(16, (block_rows // 16) * 16)
    w_t = jnp.swapaxes(weight, 0, 1).astype(features.dtype)   # tiny (D, C)
    b = bias.reshape(1, c).astype(jnp.float32)

    return pl.pallas_call(
        _linear_head_kernel,
        out_shape=jax.ShapeDtypeStruct((n, c), jnp.float32),
        grid_spec=pltpu.PrefetchScalarGridSpec(
            num_scalar_prefetch=0,
            grid=(pl.cdiv(n, tile_rows),),
            in_specs=[
                pl.BlockSpec((tile_rows, d), lambda i: (i, 0)),
                pl.BlockSpec((d, c), lambda i: (0, 0)),       # resident W^T
                pl.BlockSpec((1, c), lambda i: (0, 0)),       # bias
            ],
            out_specs=pl.BlockSpec((tile_rows, c), lambda i: (i, 0)),
        ),
        compiler_params=pltpu.CompilerParams(
            dimension_semantics=("parallel",),
            vmem_limit_bytes=_pick_vmem_limit(),
        ),
    )(features, w_t, b)


# ---------------------------------------------------------------------------
# Fused head + loss (logits never written to HBM)
# ---------------------------------------------------------------------------

def _make_fused_head_loss_kernel(*, smoothing, num_classes, n_valid, tile_rows,
                                 blocks_per_partial):
    inv_n = 1.0 / n_valid

    def kernel(feat_ref, w_ref, b_ref, tgt_ref, out_ref):
        p = pl.program_id(0)
        k = pl.program_id(1)

        @pl.when(k == 0)
        def _init():
            out_ref[...] = jnp.zeros_like(out_ref)

        # nn.Linear head on the MXU; logits stay in VMEM/f32 only.
        logits = jnp.dot(feat_ref[...], w_ref[...],
                         preferred_element_type=jnp.float32)
        logits = logits + b_ref[...].astype(jnp.float32)            # (TN, C)

        row = jax.lax.broadcasted_iota(jnp.int32, (tile_rows, 1), 0)
        global_row = (p * blocks_per_partial + k) * tile_rows + row

        out_ref[...] += _block_loss_sum(
            logits, tgt_ref[...], global_row,
            smoothing=smoothing, num_classes=num_classes,
            n_valid=n_valid, inv_n=inv_n)

    return kernel


def fused_head_label_smoothing_loss(features, weight, bias, target,
                                    smoothing=0.1, *, block_rows=2048,
                                    num_partials=None):
    """features: (N, D); weight: (C, D) PyTorch layout; bias: (C,); target: (N,)."""
    n, d = features.shape
    c = weight.shape[0]
    tile_rows, total_blocks, num_partials, blocks_per_partial = _partition(
        n, block_rows, num_partials)

    w_t = jnp.swapaxes(weight, 0, 1).astype(features.dtype)     # tiny (D, C)
    b = bias.reshape(1, c).astype(jnp.float32)
    tgt = target.astype(jnp.int32).reshape(n, 1)

    kernel = _make_fused_head_loss_kernel(
        smoothing=smoothing, num_classes=c, n_valid=n, tile_rows=tile_rows,
        blocks_per_partial=blocks_per_partial)

    last_block = total_blocks - 1

    def row_index(p, k):
        return (jnp.minimum(p * blocks_per_partial + k, last_block), 0)

    cost = pl.CostEstimate(
        flops=2 * n * d * c + 6 * n * c,
        transcendentals=n * c + n,
        bytes_accessed=(n * d * features.dtype.itemsize
                        + d * c * features.dtype.itemsize + c * 4 + n * 4
                        + num_partials * 8 * 128 * 4),
    )

    out = pl.pallas_call(
        kernel,
        out_shape=jax.ShapeDtypeStruct((num_partials * 8, 128), jnp.float32),
        grid_spec=pltpu.PrefetchScalarGridSpec(
            num_scalar_prefetch=0,
            grid=(num_partials, blocks_per_partial),
            in_specs=[
                pl.BlockSpec((tile_rows, d), row_index),        # activations
                pl.BlockSpec((d, c), lambda p, k: (0, 0)),      # resident W^T
                pl.BlockSpec((1, c), lambda p, k: (0, 0)),      # bias
                pl.BlockSpec((tile_rows, 1), row_index),        # targets
            ],
            out_specs=pl.BlockSpec((8, 128), lambda p, k: (p, 0)),
        ),
        compiler_params=pltpu.CompilerParams(
            dimension_semantics=("parallel", "arbitrary"),
            vmem_limit_bytes=_pick_vmem_limit(),
        ),
        cost_estimate=cost,
    )(features, w_t, b, tgt)

    return jnp.sum(out[::8, 0])


# ---------------------------------------------------------------------------
# Reference & self-test
# ---------------------------------------------------------------------------

def _ref_loss(logits, target, smoothing=0.1):
    logprobs = jax.nn.log_softmax(logits.astype(jnp.float32), axis=-1)
    nll = -jnp.take_along_axis(logprobs, target[:, None], axis=-1)[:, 0]
    smooth = -jnp.mean(logprobs, axis=-1)
    return jnp.mean((1.0 - smoothing) * nll + smoothing * smooth)


if __name__ == "__main__":
    key = jax.random.PRNGKey(0)
    k1, k2, k3, k4, k5, k6 = jax.random.split(key, 6)

    # ---- Standalone loss: Cassava-like 5 classes, ragged batch, multiple ---
    # ---- tiles, 2-way partial sums (exercises the parallel axis + masking).
    N, C = 300, 5
    x = jax.random.normal(k1, (N, C), dtype=jnp.float32)
    t = jax.random.randint(k2, (N,), 0, C, dtype=jnp.int32)

    loss = label_smoothing_cross_entropy(x, t, smoothing=0.1,
                                         block_rows=128, num_partials=2)
    jax.block_until_ready(loss)
    ref = _ref_loss(x, t, 0.1)
    assert jnp.allclose(loss, ref, atol=1e-5, rtol=1e-5), (loss, ref)

    # ---- bf16 logits (halved HBM read), single big tile, 1 partial. --------
    xb = x.astype(jnp.bfloat16)
    loss_b = label_smoothing_cross_entropy(xb, t, smoothing=0.1)
    jax.block_until_ready(loss_b)
    ref_b = _ref_loss(xb, t, 0.1)          # ref also casts bf16 -> f32
    assert jnp.allclose(loss_b, ref_b, atol=1e-5, rtol=1e-5), (loss_b, ref_b)

    # ---- nn.Linear head forward (module forward's trainable part). ---------
    B, D = 32, 64
    feats = jax.random.normal(k3, (B, D), dtype=jnp.float32).astype(jnp.bfloat16)
    w = (0.05 * jax.random.normal(k4, (C, D), dtype=jnp.float32)).astype(jnp.bfloat16)
    b = 0.05 * jax.random.normal(k5, (C,), dtype=jnp.float32)

    logits = classifier_head(feats, w, b)
    jax.block_until_ready(logits)
    ref_logits = jnp.dot(feats, jnp.swapaxes(w, 0, 1),
                         preferred_element_type=jnp.float32) + b
    assert jnp.allclose(logits, ref_logits, atol=1e-4, rtol=1e-4), \
        float(jnp.max(jnp.abs(logits - ref_logits)))

    # ---- Fused head + loss: logits never hit HBM. ---------------------------
    t2 = jax.random.randint(k6, (B,), 0, C, dtype=jnp.int32)
    floss = fused_head_label_smoothing_loss(feats, w, b, t2, smoothing=0.1)
    jax.block_until_ready(floss)
    fref = _ref_loss(ref_logits, t2, 0.1)
    assert jnp.allclose(floss, fref, atol=1e-4, rtol=1e-4), (floss, fref)

    print("KERNEL_OK")
</pallas_src>

<mosaic_0001>
module attributes {stable_mosaic.version = 11 : i64} {
  func.func @kernel(%arg0: i32, %arg1: i32, %arg2: memref<128x5xf32, #tpu.memory_space<vmem>>, %arg3: memref<128x1xi32, #tpu.memory_space<vmem>>, %arg4: memref<8x128xf32, #tpu.memory_space<vmem>>) attributes {dimension_semantics = [#tpu.dimension_semantics<parallel>, #tpu.dimension_semantics<arbitrary>], iteration_bounds = array<i64: 2, 2>, scalar_prefetch = 0 : i64, scratch_operands = 0 : i64, tpu.core_type = #tpu.core_type<tc>, window_params = [{transform_indices = @transform_0, window_bounds = array<i64: 128, 5>}, {transform_indices = @transform_1, window_bounds = array<i64: 128, 1>}, {transform_indices = @transform_2, window_bounds = array<i64: 8, 128>}]} {
    %c0_i32 = arith.constant 0 : i32
    %0 = arith.cmpi eq, %arg1, %c0_i32 : i32
    %1 = arith.extui %0 : i1 to i32
    %c0_i32_0 = arith.constant 0 : i32
    %2 = arith.cmpi ne, %1, %c0_i32_0 : i32
    scf.if %2 {
      %cst_17 = arith.constant 0.000000e+00 : f32
      %51 = vector.broadcast %cst_17 : f32 to vector<8x128xf32>
      %c0_18 = arith.constant 0 : index
      %c0_19 = arith.constant 0 : index
      %52 = vector.load %arg4[%c0_18, %c0_19] : memref<8x128xf32, #tpu.memory_space<vmem>>, vector<8x128xf32>
      tpu.vector_store %arg4[%c0_18, %c0_19], %51 {strides = array<i32>} : memref<8x128xf32, #tpu.memory_space<vmem>>, vector<8x128xf32>,
    } else {
    }
    %3 = tpu.iota {dimensions = array<i32: 0>} : vector<128x1xi32>
    %c2_i32 = arith.constant 2 : i32
    %4 = arith.muli %arg0, %c2_i32 : i32
    %5 = arith.addi %4, %arg1 : i32
    %c128_i32 = arith.constant 128 : i32
    %6 = arith.muli %5, %c128_i32 : i32
    %7 = vector.broadcast %6 : i32 to vector<128x1xi32>
    %8 = arith.addi %7, %3 : vector<128x1xi32>
    %c0 = arith.constant 0 : index
    %c0_1 = arith.constant 0 : index
    %9 = vector.load %arg2[%c0, %c0_1] : memref<128x5xf32, #tpu.memory_space<vmem>>, vector<128x5xf32>
    %c0_2 = arith.constant 0 : index
    %c0_3 = arith.constant 0 : index
    %10 = vector.load %arg3[%c0_2, %c0_3] : memref<128x1xi32, #tpu.memory_space<vmem>>, vector<128x1xi32>
    %c300_i32 = arith.constant 300 : i32
    %11 = vector.broadcast %c300_i32 : i32 to vector<128x1xi32>
    %12 = arith.cmpi slt, %8, %11 : vector<128x1xi32>
    %cst = arith.constant 0.000000e+00 : f32
    %13 = vector.shape_cast %12 : vector<128x1xi1> to vector<128x1xi1>
    %14 = vector.broadcast %13 : vector<128x1xi1> to vector<128x5xi1>
    %15 = vector.broadcast %cst : f32 to vector<128x5xf32>
    %16 = arith.select %14, %9, %15 : vector<128x5xi1>, vector<128x5xf32>
    %cst_4 = arith.constant dense<0xFF800000> : vector<128xf32>
    %17 = vector.multi_reduction <maximumf>, %16, %cst_4 [1] : vector<128x5xf32> to vector<128xf32>
    %18 = vector.shape_cast %17 : vector<128xf32> to vector<128x1xf32>
    %19 = vector.broadcast %18 : vector<128x1xf32> to vector<128x5xf32>
    %20 = arith.subf %16, %19 : vector<128x5xf32>
    %21 = math.exp %20 : vector<128x5xf32>
    %cst_5 = arith.constant dense<0.000000e+00> : vector<128xf32>
    %22 = vector.multi_reduction <add>, %21, %cst_5 [1] : vector<128x5xf32> to vector<128xf32>
    %23 = vector.shape_cast %22 : vector<128xf32> to vector<128x1xf32>
    %24 = math.log %23 : vector<128x1xf32>
    %25 = vector.broadcast %24 : vector<128x1xf32> to vector<128x5xf32>
    %26 = arith.subf %20, %25 : vector<128x5xf32>
    %27 = tpu.iota {dimensions = array<i32: 1>} : vector<128x5xi32>
    %28 = vector.broadcast %10 : vector<128x1xi32> to vector<128x5xi32>
    %29 = arith.cmpi eq, %27, %28 : vector<128x5xi32>
    %30 = arith.extui %29 : vector<128x5xi1> to vector<128x5xi32>
    %31 = arith.sitofp %30 : vector<128x5xi32> to vector<128x5xf32>
    %cst_6 = arith.constant 0.899999976 : f32
    %32 = vector.broadcast %cst_6 : f32 to vector<128x5xf32>
    %33 = arith.mulf %32, %31 : vector<128x5xf32>
    %cst_7 = arith.constant 2.000000e-02 : f32
    %34 = vector.broadcast %cst_7 : f32 to vector<128x5xf32>
    %35 = arith.addf %34, %33 : vector<128x5xf32>
    %36 = arith.mulf %35, %26 : vector<128x5xf32>
    %cst_8 = arith.constant dense<0.000000e+00> : vector<128xf32>
    %37 = vector.multi_reduction <add>, %36, %cst_8 [1] : vector<128x5xf32> to vector<128xf32>
    %38 = vector.shape_cast %37 : vector<128xf32> to vector<128x1xf32>
    %cst_9 = arith.constant 0.000000e+00 : f32
    %39 = vector.broadcast %cst_9 : f32 to vector<128x1xf32>
    %40 = arith.subf %39, %38 : vector<128x1xf32>
    %cst_10 = arith.constant 0.00333333341 : f32
    %41 = vector.broadcast %cst_10 : f32 to vector<128x1xf32>
    %42 = arith.mulf %40, %41 : vector<128x1xf32>
    %cst_11 = arith.constant 0.000000e+00 : f32
    %43 = vector.broadcast %cst_11 : f32 to vector<128x1xf32>
    %44 = arith.select %12, %42, %43 : vector<128x1xi1>, vector<128x1xf32>
    %cst_12 = arith.constant dense<0.000000e+00> : vector<1xf32>
    %45 = vector.multi_reduction <add>, %44, %cst_12 [0] : vector<128x1xf32> to vector<1xf32>
    %46 = vector.shape_cast %45 : vector<1xf32> to vector<1x1xf32>
    %c0_13 = arith.constant 0 : index
    %c0_14 = arith.constant 0 : index
    %47 = vector.load %arg4[%c0_13, %c0_14] : memref<8x128xf32, #tpu.memory_space<vmem>>, vector<8x128xf32>
    %48 = vector.broadcast %46 : vector<1x1xf32> to vector<8x128xf32>
    %49 = arith.addf %47, %48 : vector<8x128xf32>
    %c0_15 = arith.constant 0 : index
    %c0_16 = arith.constant 0 : index
    %50 = vector.load %arg4[%c0_15, %c0_16] : memref<8x128xf32, #tpu.memory_space<vmem>>, vector<8x128xf32>
    tpu.vector_store %arg4[%c0_15, %c0_16], %49 {strides = array<i32>} : memref<8x128xf32, #tpu.memory_space<vmem>>, vector<8x128xf32>,
    return
  }
  func.func @transform_0(%arg0: i32, %arg1: i32) -> (i32, i32) {
    %c2_i32 = arith.constant 2 : i32
    %0 = arith.muli %arg0, %c2_i32 : i32
    %1 = arith.addi %0, %arg1 : i32
    %c2_i32_0 = arith.constant 2 : i32
    %2 = arith.minsi %1, %c2_i32_0 : i32
    %c0_i32 = arith.constant 0 : i32
    %c0_i32_1 = arith.constant 0 : i32
    return %2, %c0_i32 : i32, i32
  }
  func.func @transform_1(%arg0: i32, %arg1: i32) -> (i32, i32) {
    %c2_i32 = arith.constant 2 : i32
    %0 = arith.muli %arg0, %c2_i32 : i32
    %1 = arith.addi %0, %arg1 : i32
    %c2_i32_0 = arith.constant 2 : i32
    %2 = arith.minsi %1, %c2_i32_0 : i32
    %c0_i32 = arith.constant 0 : i32
    %c0_i32_1 = arith.constant 0 : i32
    return %2, %c0_i32 : i32, i32
  }
  func.func @transform_2(%arg0: i32, %arg1: i32) -> (i32, i32) {
    %c0_i32 = arith.constant 0 : i32
    %c0_i32_0 = arith.constant 0 : i32
    return %arg0, %c0_i32 : i32, i32
  }
}

</mosaic_0001>

<bundles_post_ra>
// kernel: tpu_custom_call.1
= control target key start
LH: loop header
LB: loop body
LE: loop exit
PB: predicated region body
PF: predicated region fallthrough
CT: control target
= control target key end

     0   :  { %7 = vsyncpa [#allocation3], 0  ;;  %s1803_s0 = inlined_call_operand.vmem [shape: f32[300,5], index: 0, kind: input, shape index: {}]   ;;  %s1804_s1 = inlined_call_operand.vmem [shape: s32[300,1], index: 1, kind: input, shape index: {}]   ;;  %s1805_s2 = inlined_call_operand.hbm [shape: f32[16,128], index: 2, kind: output, shape index: {}]  }
   0x1   :  { %9 = vsyncpa [#allocation3 + $0x1], 0  ;;  %s1259_s9 = smov 0   ;;  %s1261_s10 = smov 0  }
   0x2   :  { %s1263_s11 = smov 0   ;;  %s1265_s12 = smov 0  }
   0x3   :  { %s1267_s13 = smov 0   ;;  %s1269_s14 = smov 0  }
   0x4   :  { %s1271_s15 = smov 0   ;;  %s1273_s16 = smov 0  }
   0x5 LB: > { %s967_s17 = sadd.s32 4294967295, %s1238_s16   ;;  %s968_s18 = sadd.s32 4294967294, %s1238_s16   ;;  %s1238_s16 = sphi %s1273_s16, %s15_s16   ;;  %s1234_s15 = sphi %s1271_s15, %s1824_s15   ;;  %s1230_s14 = sphi %s1269_s14, %s1823_s14   ;;  %s1226_s13 = sphi %s1267_s13, %s1822_s13   ;;  %s1222_s12 = sphi %s1265_s12, %s1821_s12   ;;  %s1218_s11 = sphi %s1263_s11, %s1820_s11   ;;  %s1214_s10 = sphi %s1261_s10, %s1819_s10   ;;  %s1210_s9 = sphi %s1259_s9, %s1818_s9  }
   0x6   : > { %s24_s19 = sadd.s32 1, %s1230_s14  ;;  %s27_s20 = sadd.s32 1, %s1234_s15 }
   0x7   : > { %p25_p0 = scmp.ge.s32.totalorder %s24_s19, 2  ;;  %p112_p1 = scmp.ne.s32.totalorder %s1218_s11, %s1214_s10 }
   0x8   : > { %p113_p2 = scmp.eq.s32.totalorder %s967_s17, 3  ;;  %p118_p4 = scmp.ne.s32.totalorder %s1214_s10, %s1210_s9 }
   0x9   : > { %s1826_s19 = smov (%p25_p0, %s24_s19), 0  ;;  %s1828_s20 = smov (!%p25_p0, %s27_s20), %s1234_s15 }
   0xa   : > { %p1308_p3 = por %p113_p2, %p112_p1  ;;  %p29_p5 = scmp.ge.s32.totalorder %s1828_s20, 2 }
   0xb   : > { %p119_p6 = scmp.eq.s32.totalorder %s968_s18, 3  ;;  %p975_p7 = scmp.ge.s32.totalorder %s1238_s16, 1 }
   0xc   : > { %p187_p8 = scmp.lt.s32.totalorder %s1238_s16, 5  ;;  %s1830_s20 = smov (%p29_p5, %s1828_s20), 0 }
   0xd   : > { %p1318_p9 = por %p119_p6, %p118_p4  ;;  %s99_s23 = ssub.s32 %s1234_s15, %s1830_s20 }
   0xe   : > { %p188_p10 = pnand %p975_p7, %p187_p8  ;;  %s102_s24 = sadd.s32 1, %s1218_s11 }
   0xf   : > { %p100_p11 = scmp.eq.s32.totalorder %s99_s23, 0  ;;  %s227_s26 = sand.u32 (!%p188_p10), 1, %s1214_s10  }
  0x10   : > { %191 = sbr.rel (%p188_p10) target bundleno = 615 (0x267), region = 28  ;;  %s977_s27 = sshll.u32 (!%p188_p10), %s1226_s13, 1 }
  0x11   : > { %s1326_s25 = scalar_select %p100_p11, %s1218_s11, %s102_s24  }
  0x12   : > { %s976_s28 = sshll.u32 (!%p188_p10), %s227_s26, 3  ;;  %s231_s29 = sadd.s32 (!%p188_p10), %s1222_s12, %s977_s27 }
  0x13   : > { %p232_p12 = scmp.lt.s32.totalorder (!%p188_p10), %s231_s29, 2  ;;  %s1343_s23 = scalar_lea.vmem (!%p188_p10), [#allocation2], %s976_s28 }
  0x14   : > { %p983_p0 = scmp.ne.s32.totalorder (!%p188_p10), %s1222_s12, 0 }
  0x15   : > { %s233_s30 = scalar_select %p232_p12, %s231_s29, 2 }
  0x17   : > { %s978_s3 = sshll.u32 %s233_s30, 4 }
  0x18   : > { %p239_p13 = scmp.lt.s32.totalorder %s978_s3, 37  ;;  %277 = sbr.rel (%p983_p0) target bundleno = 31 (0x1f), region = 32 }
  0x1a   : > { %s1832_s3 = smov (!%p239_p13, %s978_s3), 37 }
  0x1b   : > { %s979_s4 = sshll.u32 %s1832_s3, 3 }
  0x1c   : > { %s1336_s7 = scalar_lea.vmem %s1803_s0, %s979_s4  ;;  %s1341_s18 = scalar_lea.vmem %s1804_s1, %s979_s4 }
  0x1d   : > { %v1240_v0 = vmov 0.0  }
  0x1e   : > { %278 = vst [vmem:[%s1343_s23] sm:$0xff] %v1240_v0 }
  0x1f PF: > { %v279_v1 = vlaneseq  ;;  %s985_s24 = sshll.u32 %s231_s29, 7  ;;  %v1241_v3 = vmov 0   ;;  %vm412_vm0 = vcmask 39936   ;;  %v316_v6 = vld [vmem:[%s1336_s7] sm:$0xff]  ;;  %v318_v15 = vld [vmem:[%s1336_s7 + $0x10] sm:$0xff]  ;;  %v317_v17 = vld [vmem:[%s1336_s7 + $0x8] sm:$0xff] }
  0x20   : > { %v1347_v2 = vstv %s985_s24  ;;  %1080 = vset.pattern.permute.xlu1 %v1241_v3  ;;  %1081 = vset.pattern.permute.xlu0 %v1241_v3  ;;  %v319_v19 = vld [vmem:[%s1336_s7 + $0x18] sm:$0xff]  ;;  %v320_v22 = vld [vmem:[%s1336_s7 + $0x20] sm:$0xff]  ;;  %v321_v32 = vld [vmem:[%s1336_s7 + $0x28] sm:$0xff]  ;;  %s1003_s12 = sshll.u32 %s1226_s13, 7  ;;  %s885_s27 = sshll.u32 %s1343_s23, 4  ;;  %s886_s27 = int_to_ptr.vmem [resolvable:$true] %s885_s27 }
  0x21   : > { %v1350_v4 = vshrl.u32 %v279_v1, 7  ;;  %v322_v35 = vld [vmem:[%s1336_s7 + $0x30] sm:$0xff]  ;;  %v323_v41 = vld [vmem:[%s1336_s7 + $0x38] sm:$0xff]  ;;  %v324_v47 = vld [vmem:[%s1336_s7 + $0x40] sm:$0xff]  ;;  %s883_s30 = scalar_lea.hbm %s1805_s2, %s1003_s12  ;;  %s872_s3 = scalar_lea.sflag [#allocation3], %s227_s26 }
  0x22   : > { %v325_v52 = vld [vmem:[%s1336_s7 + $0x48] sm:$0xff]  ;;  %v326_v57 = vld [vmem:[%s1336_s7 + $0x50] sm:$0xff]  ;;  %v327_v62 = vld [vmem:[%s1336_s7 + $0x58] sm:$0xff]  ;;  %s1146_s4 = scalar_lea.vmem %s886_s27, 128  ;;  %s1243_s5 = smov [#allocation2]  }
  0x23   : > { %v1354_v5 = vadd.s32 %v1347_v2, %v1350_v4  ;;  %v282_v7 = vadd.s32 16, %v1350_v4  ;;  %v281_v8 = vadd.s32 8, %v1350_v4  ;;  %v283_v9 = vadd.s32 24, %v1350_v4  ;;  %p1147_p1 = scmp.ne.s32.totalorder %s886_s27, %s1146_s4  ;;  %s1150_s6 = sshll.u32 %s1243_s5, 4  ;;  %s1151_s6 = int_to_ptr.vmem [resolvable:$false] %s1150_s6 }
  0x24   : > { %v284_v10 = vadd.s32 32, %v1350_v4  ;;  %v285_v11 = vadd.s32 40, %v1350_v4  ;;  %v286_v12 = vadd.s32 48, %v1350_v4  ;;  %v287_v13 = vadd.s32 56, %v1350_v4  ;;  %s1152_s13 = scalar_lea.vmem %s1151_s6, 256  ;;  %p1153_p5 = scmp.lt.s32.totalorder %s886_s27, %s1151_s6 }
  0x25   : > { %vm348_vm1 = vcmp.lt.s32.totalorder %v1354_v5, 300  ;;  %v1366_v14 = vadd.s32 %v1347_v2, %v282_v7  ;;  %v1370_v16 = vadd.s32 %v1347_v2, %v281_v8  ;;  %v1374_v18 = vadd.s32 %v1347_v2, %v283_v9  ;;  %v328_v7 = vld [vmem:[%s1336_s7 + $0x60] sm:$0xff]  ;;  %p1148_p2 = pnand %p1147_p1, %p1308_p3  ;;  %p1154_p6 = scmp.lt.s32.totalorder %s1152_s13, %s1146_s4 }
  0x26   : > { %v1379_v20 = vsel %vm348_vm1, %v316_v6, 0.0  ;;  %v1382_v21 = vadd.s32 %v1347_v2, %v284_v10  ;;  %v1386_v23 = vadd.s32 %v1347_v2, %v285_v11  ;;  %v1389_v24 = vadd.s32 %v1347_v2, %v286_v12  ;;  %v329_v10 = vld [vmem:[%s1336_s7 + $0x68] sm:$0xff] }
  0x27   : > { %v413_v25 = vsel %vm412_vm0, %v1379_v20, -inf  ;;  %vm350_vm2 = vcmp.lt.s32.totalorder %v1366_v14, 300  ;;  %vm349_vm3 = vcmp.lt.s32.totalorder %v1370_v16, 300  ;;  %vm351_vm4 = vcmp.lt.s32.totalorder %v1374_v18, 300  ;;  %p1149_p4 = pneg %p1148_p2  ;;  %p1155_p7 = por %p1154_p6, %p1153_p5 }
  0x28   : > { %414 = vmax.xlane.f32.xlu0 %v413_v25  ;;  %v1398_v26 = vsel %vm350_vm2, %v318_v15, 0.0  ;;  %v1402_v27 = vsel %vm349_vm3, %v317_v17, 0.0  ;;  %v1406_v28 = vsel %vm351_vm4, %v319_v19, 0.0  ;;  %vm352_vm5 = vcmp.lt.s32.totalorder %v1382_v21, 300  ;;  %v330_v15 = vld [vmem:[%s1336_s7 + $0x70] sm:$0xff]  ;;  %v331_v19 = vld [vmem:[%s1336_s7 + $0x78] sm:$0xff] }
  0x29   : > { %v419_v29 = vsel %vm412_vm0, %v1398_v26, -inf  ;;  %v416_v30 = vsel %vm412_vm0, %v1402_v27, -inf  ;;  %v1415_v31 = vsel %vm352_vm5, %v320_v22, 0.0  ;;  %vm353_vm6 = vcmp.lt.s32.totalorder %v1386_v23, 300  ;;  %p1156_p8 = pnand %p1155_p7, %p1149_p4 }
  0x2a   : > { %420 = vmax.xlane.f32.xlu1 %v419_v29  ;;  %v1420_v33 = vadd.s32 %v1347_v2, %v287_v13  ;;  %v422_v34 = vsel %vm412_vm0, %v1406_v28, -inf  ;;  %vm354_vm7 = vcmp.lt.s32.totalorder %v1389_v24, 300  ;;  %v288_v36 = vadd.s32 64, %v1350_v4 }
  0x2b   : > { %v289_v37 = vadd.s32 72, %v1350_v4  ;;  %v425_v38 = vsel %vm412_vm0, %v1415_v31, -inf  ;;  %v1432_v39 = vsel %vm353_vm6, %v321_v32, 0.0  ;;  %v290_v40 = vadd.s32 80, %v1350_v4 }
  0x2c   : > { %417 = vmax.xlane.f32.xlu0 %v416_v30  ;;  %vm355_vm8 = vcmp.lt.s32.totalorder %v1420_v33, 300  ;;  %v1438_v42 = vadd.s32 %v1347_v2, %v288_v36  ;;  %v291_v44 = vadd.s32 88, %v1350_v4  ;;  %v1446_v45 = vsel %vm354_vm7, %v322_v35, 0.0  ;;  %v333_v35 = vld [vmem:[%s1341_s18 + $0x8] sm:$0xff]  ;;  %v335_v36 = vld [vmem:[%s1341_s18 + $0x18] sm:$0xff] }
  0x2d   : > { %v1441_v43 = vadd.s32 %v1347_v2, %v289_v37  ;;  %v428_v46 = vsel %vm412_vm0, %v1432_v39, -inf  ;;  %v1453_v48 = vadd.s32 %v1347_v2, %v290_v40  ;;  %v292_v49 = vadd.s32 96, %v1350_v4  ;;  %v334_v37 = vld [vmem:[%s1341_s18 + $0x10] sm:$0xff] }
  0x2e   : > { %423 = vmax.xlane.f32.xlu1 %v422_v34  ;;  %vm356_vm9 = vcmp.lt.s32.totalorder %v1438_v42, 300  ;;  %v1458_v50 = vsel %vm355_vm8, %v323_v41, 0.0  ;;  %v431_v51 = vsel %vm412_vm0, %v1446_v45, -inf  ;;  %v1465_v53 = vadd.s32 %v1347_v2, %v291_v44  ;;  %v332_v34 = vld [vmem:[%s1341_s18] sm:$0xff] }
  0x2f   : > { %vm357_vm10 = vcmp.lt.s32.totalorder %v1441_v43, 300  ;;  %v293_v54 = vadd.s32 104, %v1350_v4  ;;  %v1470_v55 = vsel %vm356_vm9, %v324_v47, 0.0  ;;  %v434_v56 = vsel %vm412_vm0, %v1458_v50, -inf }
  0x30   : > { %426 = vmax.xlane.f32.xlu0 %v425_v38  ;;  %vm358_vm11 = vcmp.lt.s32.totalorder %v1453_v48, 300  ;;  %v1477_v58 = vadd.s32 %v1347_v2, %v292_v49  ;;  %v294_v59 = vadd.s32 112, %v1350_v4  ;;  %v1482_v60 = vsel %vm357_vm10, %v325_v52, 0.0 }
  0x31   : > { %v437_v61 = vsel %vm412_vm0, %v1470_v55, -inf  ;;  %vm1810_vm12 = vcmp.lt.s32.totalorder %v1465_v53, 300  ;;  %v1489_v63 = vadd.s32 %v1347_v2, %v293_v54  ;;  %v295_v0 = vadd.s32 120, %v1350_v4 }
  0x32   : > { %429 = vmax.xlane.f32.xlu1 %v428_v46  ;;  %v1494_v3 = vsel %vm358_vm11, %v326_v57, 0.0  ;;  %v440_v6 = vsel %vm412_vm0, %v1482_v60, -inf  ;;  %vm1806_vm13 = vcmp.lt.s32.totalorder %v1477_v58, 300  ;;  %v1501_v8 = vadd.s32 %v1347_v2, %v294_v59 }
  0x33   : > { %v1505_v4 = vsel %vm1810_vm12, %v327_v62, 0.0  ;;  %v443_v9 = vsel %vm412_vm0, %v1494_v3, -inf  ;;  %vm1809_vm14 = vcmp.lt.s32.totalorder %v1489_v63, 300  ;;  %v1512_v11 = vadd.s32 %v1347_v2, %v295_v0 }
  0x34   : > { %432 = vmax.xlane.f32.xlu0 %v431_v51  ;;  %v1516_v12 = vsel %vm1806_vm13, %v328_v7, 0.0  ;;  %v446_v13 = vsel %vm412_vm0, %v1505_v4, -inf  ;;  %vm1808_vm15 = vcmp.lt.s32.totalorder %v1501_v8, 300  ;;  %v1524_v17 = vsel %vm1809_vm14, %v329_v10, 0.0 }
  0x35   : > { %v449_v2 = vsel %vm412_vm0, %v1516_v12, -inf  ;;  %vm1807_vm13 = vcmp.lt.s32.totalorder %v1512_v11, 300  ;;  %v1532_v22 = vsel %vm1808_vm15, %v330_v15, 0.0  ;;  %v452_v25 = vsel %vm412_vm0, %v1524_v17, -inf }
  0x36   : > { %435 = vmax.xlane.f32.xlu1 %v434_v56  ;;  %v1538_v29 = vsel %vm1807_vm13, %v331_v19, 0.0  ;;  %v455_v30 = vsel %vm412_vm0, %v1532_v22, -inf }
  0x37   : > { %v458_v32 = vsel %vm412_vm0, %v1538_v29, -inf }
  0x38   : > { %438 = vmax.xlane.f32.xlu0 %v437_v61 }
  0x3a   : > { %441 = vmax.xlane.f32.xlu1 %v440_v6 }
  0x3c   : > { %444 = vmax.xlane.f32.xlu0 %v443_v9 }
  0x3e   : > { %447 = vmax.xlane.f32.xlu1 %v446_v13 }
  0x40   : > { %450 = vmax.xlane.f32.xlu0 %v449_v2 }
  0x42   : > { %453 = vmax.xlane.f32.xlu1 %v452_v25 }
  0x44   : > { %456 = vmax.xlane.f32.xlu0 %v455_v30 }
  0x46   : > { %459 = vmax.xlane.f32.xlu1 %v458_v32 }
  0x57   : > { %608 = vperm.xlu1 %1080, %v332_v34  }
  0x5a   : > { %611 = vperm.xlu0 %1081, %v333_v35  }
  0x5b   : > { %617 = vperm.xlu1 %1080, %v335_v36  }
  0x5e   : > { %614 = vperm.xlu0 %1081, %v334_v37  }
  0xb1   : > { %v415_v38 = vpop.xlane.xlu0 %414 }
  0xb2   : > { %v1549_v40 = vsub.f32 %v1379_v20, %v415_v38 }
  0xb3   : > { %v421_v41 = vpop.xlane.xlu1 %420 }
  0xb4   : > { %v477_v44 = vmul.f32 1.442695, %v1549_v40  ;;  %v1553_v46 = vsub.f32 %v1398_v26, %v421_v41 }
  0xb5   : > { %v418_v47 = vpop.xlane.xlu0 %417 }
  0xb6   : > { %1082 = vpow2.f32 %v477_v44  ;;  %v481_v49 = vmul.f32 1.442695, %v1553_v46  ;;  %v1557_v51 = vsub.f32 %v1402_v27, %v418_v47 }
  0xb7   : > { %v424_v52 = vpop.xlane.xlu1 %423 }
  0xb8   : > { %1084 = vpow2.f32 %v481_v49  ;;  %v479_v54 = vmul.f32 1.442695, %v1557_v51  ;;  %v1561_v20 = vsub.f32 %v1406_v28, %v424_v52 }
  0xb9   : > { %v427_v56 = vpop.xlane.xlu0 %426 }
  0xba   : > { %1086 = vpow2.f32 %v479_v54  ;;  %v483_v57 = vmul.f32 1.442695, %v1561_v20  ;;  %v1565_v26 = vsub.f32 %v1415_v31, %v427_v56 }
  0xbb   : > { %v430_v59 = vpop.xlane.xlu1 %429 }
  0xbc   : > { %1088 = vpow2.f32 %v483_v57  ;;  %v485_v61 = vmul.f32 1.442695, %v1565_v26  ;;  %v1569_v27 = vsub.f32 %v1432_v39, %v430_v59 }
  0xbd   : > { %v433_v62 = vpop.xlane.xlu0 %432 }
  0xbe   : > { %1090 = vpow2.f32 %v485_v61  ;;  %v487_v0 = vmul.f32 1.442695, %v1569_v27  ;;  %v1573_v28 = vsub.f32 %v1446_v45, %v433_v62 }
  0xbf   : > { %v436_v6 = vpop.xlane.xlu1 %435 }
  0xc0   : > { %1092 = vpow2.f32 %v487_v0  ;;  %v489_v7 = vmul.f32 1.442695, %v1573_v28  ;;  %v1577_v31 = vsub.f32 %v1458_v50, %v436_v6 }
  0xc1   : > { %v439_v9 = vpop.xlane.xlu0 %438 }
  0xc2   : > { %1094 = vpow2.f32 %v489_v7  ;;  %v491_v10 = vmul.f32 1.442695, %v1577_v31  ;;  %v1581_v39 = vsub.f32 %v1470_v55, %v439_v9 }
  0xc3   : > { %v1083_v13 = vpop.eup %1082  ;;  %v442_v15 = vpop.xlane.xlu1 %441 }
  0xc4   : > { %1096 = vpow2.f32 %v491_v10  ;;  %v493_v45 = vmul.f32 1.442695, %v1581_v39  ;;  %v1585_v2 = vsub.f32 %v1482_v60, %v442_v15  ;;  %v509_v19 = vsel %vm412_vm0, %v1083_v13, 0.0 }
  0xc5   : > { %v1085_v25 = vpop.eup %1084  ;;  %510 = vadd.xlane.f32.xlu0 %v509_v19  ;;  %v445_v50 = vpop.xlane.xlu0 %444 }
  0xc6   : > { %1098 = vpow2.f32 %v493_v45  ;;  %v495_v30 = vmul.f32 1.442695, %v1585_v2  ;;  %v1590_v32 = vsub.f32 %v1494_v3, %v445_v50  ;;  %v515_v55 = vsel %vm412_vm0, %v1085_v25, 0.0 }
  0xc7   : > { %v1087_v34 = vpop.eup %1086  ;;  %v448_v35 = vpop.xlane.xlu1 %447 }
  0xc8   : > { %1100 = vpow2.f32 %v495_v30  ;;  %v497_v36 = vmul.f32 1.442695, %v1590_v32  ;;  %v1595_v60 = vsub.f32 %v1505_v4, %v448_v35  ;;  %v512_v37 = vsel %vm412_vm0, %v1087_v34, 0.0 }
  0xc9   : > { %v1089_v38 = vpop.eup %1088  ;;  %516 = vadd.xlane.f32.xlu0 %v515_v55  ;;  %513 = vadd.xlane.f32.xlu1 %v512_v37  ;;  %v451_v41 = vpop.xlane.xlu0 %450 }
  0xca   : > { %1102 = vpow2.f32 %v497_v36  ;;  %v499_v3 = vmul.f32 1.442695, %v1595_v60  ;;  %v1600_v44 = vsub.f32 %v1516_v12, %v451_v41  ;;  %v518_v47 = vsel %vm412_vm0, %v1089_v38, 0.0  ;;  %v337_v38 = vld [vmem:[%s1341_s18 + $0x28] sm:$0xff]  ;;  %v336_v41 = vld [vmem:[%s1341_s18 + $0x20] sm:$0xff] }
  0xcb   : > { %v1091_v49 = vpop.eup %1090  ;;  %v454_v52 = vpop.xlane.xlu1 %453 }
  0xcc   : > { %1104 = vpow2.f32 %v499_v3  ;;  %v501_v4 = vmul.f32 1.442695, %v1600_v44  ;;  %v1605_v54 = vsub.f32 %v1524_v17, %v454_v52  ;;  %v521_v56 = vsel %vm412_vm0, %v1091_v49, 0.0  ;;  %v338_v3 = vld [vmem:[%s1341_s18 + $0x30] sm:$0xff]  ;;  %v339_v52 = vld [vmem:[%s1341_s18 + $0x38] sm:$0xff] }
  0xcd   : > { %v1093_v57 = vpop.eup %1092  ;;  %519 = vadd.xlane.f32.xlu1 %v518_v47  ;;  %522 = vadd.xlane.f32.xlu0 %v521_v56  ;;  %v457_v59 = vpop.xlane.xlu0 %456  ;;  %v341_v56 = vld [vmem:[%s1341_s18 + $0x48] sm:$0xff] }
  0xce   : > { %1106 = vpow2.f32 %v501_v4  ;;  %v503_v12 = vmul.f32 1.442695, %v1605_v54  ;;  %v1610_v61 = vsub.f32 %v1532_v22, %v457_v59  ;;  %v524_v62 = vsel %vm412_vm0, %v1093_v57, 0.0  ;;  %v342_v57 = vld [vmem:[%s1341_s18 + $0x50] sm:$0xff]  ;;  %v343_v59 = vld [vmem:[%s1341_s18 + $0x58] sm:$0xff] }
  0xcf   : > { %v1095_v0 = vpop.eup %1094  ;;  %v460_v47 = vpop.xlane.xlu1 %459 }
  0xd0   : > { %1108 = vpow2.f32 %v503_v12  ;;  %v505_v6 = vmul.f32 1.442695, %v1610_v61  ;;  %v527_v17 = vsel %vm412_vm0, %v1095_v0, 0.0  ;;  %v1627_v49 = vsub.f32 %v1538_v29, %v460_v47  ;;  %v344_v12 = vld [vmem:[%s1341_s18 + $0x60] sm:$0xff]  ;;  %v346_v0 = vld [vmem:[%s1341_s18 + $0x70] sm:$0xff] }
  0xd1   : > { %v1097_v7 = vpop.eup %1096  ;;  %525 = vadd.xlane.f32.xlu1 %v524_v62  ;;  %528 = vadd.xlane.f32.xlu0 %v527_v17  ;;  %v345_v17 = vld [vmem:[%s1341_s18 + $0x68] sm:$0xff] }
  0xd2   : > { %1110 = vpow2.f32 %v505_v6  ;;  %v530_v9 = vsel %vm412_vm0, %v1097_v7, 0.0  ;;  %v507_v4 = vmul.f32 1.442695, %v1627_v49  ;;  %v340_v6 = vld [vmem:[%s1341_s18 + $0x40] sm:$0xff]  ;;  %v347_v7 = vld [vmem:[%s1341_s18 + $0x78] sm:$0xff] }
  0xd3   : > { %v1099_v10 = vpop.eup %1098 }
  0xd4   : > { %v533_v13 = vsel %vm412_vm0, %v1099_v10, 0.0  ;;  %1112 = vpow2.f32 %v507_v4  ;;  %v609_v10 = vpop.permute.xlu1 %608 }
  0xd5   : > { %v1101_v15 = vpop.eup %1100  ;;  %531 = vadd.xlane.f32.xlu1 %v530_v9  ;;  %534 = vadd.xlane.f32.xlu0 %v533_v13  ;;  %v612_v9 = vpop.permute.xlu0 %611 }
  0xd6   : > { %v536_v22 = vsel %vm412_vm0, %v1101_v15, 0.0 }
  0xd7   : > { %v1103_v45 = vpop.eup %1102 }
  0xd8   : > { %v539_v19 = vsel %vm412_vm0, %v1103_v45, 0.0  ;;  %v618_v15 = vpop.permute.xlu1 %617  ;;  %v1641_v45 = vand.u32 127, %v279_v1 }
  0xd9   : > { %v1105_v25 = vpop.eup %1104  ;;  %537 = vadd.xlane.f32.xlu1 %v536_v22  ;;  %540 = vadd.xlane.f32.xlu0 %v539_v19  ;;  %v615_v13 = vpop.permute.xlu0 %614 }
  0xda   : > { %v542_v50 = vsel %vm412_vm0, %v1105_v25, 0.0  ;;  %vm655_vm13 = vcmp.eq.s32.totalorder %v1641_v45, %v609_v10  ;;  %vm656_vm15 = vcmp.eq.s32.totalorder %v1641_v45, %v612_v9  ;;  %vm657_vm14 = vcmp.eq.s32.totalorder %v1641_v45, %v615_v13 }
  0xdb   : > { %v1107_v30 = vpop.eup %1106  ;;  %vm658_vm12 = vcmp.eq.s32.totalorder %v1641_v45, %v618_v15 }
  0xdc   : > { %v545_v55 = vsel %vm412_vm0, %v1107_v30, 0.0 }
  0xdd   : > { %v1109_v34 = vpop.eup %1108  ;;  %543 = vadd.xlane.f32.xlu1 %v542_v50  ;;  %546 = vadd.xlane.f32.xlu0 %v545_v55  ;;  %v1242_v55 = vmov 0.0  }
  0xde   : > { %v548_v35 = vsel %vm412_vm0, %v1109_v34, 0.0  ;;  %v986_v34 = vsel %vm655_vm13, 1.0, %v1242_v55 }
  0xdf   : > { %v1111_v36 = vpop.eup %1110  ;;  %v703_v1 = vmul.f32 0.9, %v986_v34 }
  0xe0   : > { %v551_v37 = vsel %vm412_vm0, %v1111_v36, 0.0 }
  0xe1   : > { %549 = vadd.xlane.f32.xlu1 %v548_v35  ;;  %552 = vadd.xlane.f32.xlu0 %v551_v37  ;;  %v1113_v62 = vpop.eup %1112  ;;  %v719_v4 = vadd.f32 0.02, %v703_v1 }
  0xe2   : > { %v554_v29 = vsel %vm412_vm0, %v1113_v62, 0.0 }
  0xf2   : > { %623 = vperm.xlu1 %1080, %v337_v38   ;;  %v987_v38 = vsel %vm656_vm15, 1.0, %v1242_v55 }
  0xf7   : > { %620 = vperm.xlu0 %1081, %v336_v41   ;;  %v988_v41 = vsel %vm657_vm14, 1.0, %v1242_v55 }
  0xf8   : > { %v705_v62 = vmul.f32 0.9, %v988_v41 }
  0xfb   : > { %626 = vperm.xlu0 %1081, %v338_v3  }
  0xff   : > { %629 = vperm.xlu0 %1081, %v339_v52  }
 0x103   : > { %635 = vperm.xlu0 %1081, %v341_v56   ;;  %v704_v56 = vmul.f32 0.9, %v987_v38 }
 0x105   : > { %v720_v13 = vadd.f32 0.02, %v704_v56 }
 0x107   : > { %638 = vperm.xlu0 %1081, %v342_v57  }
 0x10b   : > { %641 = vperm.xlu0 %1081, %v343_v59  }
 0x10f   : > { %644 = vperm.xlu0 %1081, %v344_v12   ;;  %v989_v12 = vsel %vm658_vm12, 1.0, %v1242_v55 }
 0x110   : > { %v706_v10 = vmul.f32 0.9, %v989_v12 }
 0x113   : > { %650 = vperm.xlu0 %1081, %v346_v0  }
 0x116   : > { %555 = vadd.xlane.f32.xlu1 %v554_v29 }
 0x127   : > { %632 = vperm.xlu1 %1080, %v340_v6  }
 0x12b   : > { %647 = vperm.xlu1 %1080, %v345_v17  }
 0x12f   : > { %653 = vperm.xlu1 %1080, %v347_v7  }
 0x14e   : > { %v511_v22 = vpop.xlane.xlu0 %510 }
 0x14f   : > { %1114 = vlog2.f32 %v511_v22 }
 0x152   : > { %v514_v19 = vpop.xlane.xlu1 %513  ;;  %v517_v25 = vpop.xlane.xlu0 %516 }
 0x153   : > { %1116 = vlog2.f32 %v514_v19 }
 0x154   : > { %1118 = vlog2.f32 %v517_v25 }
 0x156   : > { %v520_v50 = vpop.xlane.xlu1 %519  ;;  %v523_v30 = vpop.xlane.xlu0 %522 }
 0x157   : > { %1120 = vlog2.f32 %v520_v50 }
 0x15a   : > { %v526_v35 = vpop.xlane.xlu1 %525  ;;  %v529_v36 = vpop.xlane.xlu0 %528 }
 0x15b   : > { %1122 = vlog2.f32 %v526_v35 }
 0x15c   : > { %v1115_v37 = vpop.eup %1114  ;;  %1124 = vlog2.f32 %v523_v30 }
 0x15d   : > { %v558_v3 = vmul.f32 0.6931472, %v1115_v37  ;;  %v722_v37 = vadd.f32 0.02, %v706_v10  ;;  %1126 = vlog2.f32 %v529_v36 }
 0x15e   : > { %v532_v47 = vpop.xlane.xlu1 %531  ;;  %v1650_v52 = vpop.xlane.xlu0 %534 }
 0x15f   : > { %v589_v57 = vsub.f32 %v1549_v40, %v558_v3  ;;  %v721_v40 = vadd.f32 0.02, %v705_v62  ;;  %1128 = vlog2.f32 %v532_v47 }
 0x160   : > { %v1117_v59 = vpop.eup %1116 }
 0x161   : > { %v1119_v0 = vpop.eup %1118  ;;  %v560_v29 = vmul.f32 0.6931472, %v1117_v59  ;;  %v735_v6 = vmul.f32 %v719_v4, %v589_v57 }
 0x162   : > { %v562_v17 = vmul.f32 0.6931472, %v1119_v0  ;;  %v538_v7 = vpop.xlane.xlu1 %537  ;;  %v1654_v9 = vpop.xlane.xlu0 %540 }
 0x163   : > { %v751_v15 = vsel %vm412_vm0, %v735_v6, 0.0  ;;  %v590_v22 = vsub.f32 %v1557_v51, %v560_v29  ;;  %1130 = vlog2.f32 %v538_v7 }
 0x164   : > { %v1121_v19 = vpop.eup %1120  ;;  %752 = vadd.xlane.f32.xlu0 %v751_v15  ;;  %v591_v25 = vsub.f32 %v1553_v46, %v562_v17 }
 0x165   : > { %v564_v50 = vmul.f32 0.6931472, %v1121_v19  ;;  %v736_v34 = vmul.f32 %v720_v13, %v590_v22 }
 0x166   : > { %v544_v35 = vpop.xlane.xlu1 %543  ;;  %v737_v1 = vmul.f32 %v721_v40, %v591_v25  ;;  %v1661_v41 = vpop.xlane.xlu0 %546 }
 0x167   : > { %v754_v30 = vsel %vm412_vm0, %v736_v34, 0.0  ;;  %v592_v38 = vsub.f32 %v1561_v20, %v564_v50  ;;  %1132 = vlog2.f32 %v544_v35 }
 0x168   : > { %755 = vadd.xlane.f32.xlu1 %v754_v30  ;;  %v757_v51 = vsel %vm412_vm0, %v737_v1, 0.0  ;;  %v1123_v56 = vpop.eup %1122  ;;  %1134 = vlog2.f32 %v1650_v52 }
 0x169   : > { %758 = vadd.xlane.f32.xlu0 %v757_v51  ;;  %v738_v3 = vmul.f32 %v722_v37, %v592_v38  ;;  %v1125_v59 = vpop.eup %1124  ;;  %v568_v12 = vmul.f32 0.6931472, %v1123_v56  ;;  %1136 = vlog2.f32 %v1654_v9 }
 0x16a   : > { %v1664_v4 = vpop.xlane.xlu1 %549  ;;  %v1667_v57 = vpop.xlane.xlu0 %552  ;;  %v566_v0 = vmul.f32 0.6931472, %v1125_v59 }
 0x16b   : > { %v760_v46 = vsel %vm412_vm0, %v738_v3, 0.0  ;;  %v594_v6 = vsub.f32 %v1569_v27, %v568_v12  ;;  %v1127_v17 = vpop.eup %1126  ;;  %1138 = vlog2.f32 %v1664_v4 }
 0x16c   : > { %v593_v7 = vsub.f32 %v1565_v26, %v566_v0  ;;  %v1129_v19 = vpop.eup %1128  ;;  %v570_v40 = vmul.f32 0.6931472, %v1127_v17  ;;  %1140 = vlog2.f32 %v1661_v41 }
 0x16d   : > { %761 = vadd.xlane.f32.xlu0 %v760_v46  ;;  %v572_v37 = vmul.f32 0.6931472, %v1129_v19  ;;  %1142 = vlog2.f32 %v1667_v57 }
 0x16e   : > { %v624_v36 = vpop.permute.xlu1 %623  ;;  %v595_v26 = vsub.f32 %v1573_v28, %v570_v40 }
 0x16f   : > { %vm660_vm12 = vcmp.eq.s32.totalorder %v1641_v45, %v624_v36  ;;  %v596_v59 = vsub.f32 %v1577_v31, %v572_v37 }
 0x170   : > { %v991_v20 = vsel %vm660_vm12, 1.0, %v1242_v55  ;;  %v1131_v51 = vpop.eup %1130 }
 0x171   : > { %v708_v62 = vmul.f32 0.9, %v991_v20  ;;  %v576_v12 = vmul.f32 0.6931472, %v1131_v51 }
 0x172   : > { %v621_v29 = vpop.permute.xlu0 %620 }
 0x173   : > { %v724_v47 = vadd.f32 0.02, %v708_v62  ;;  %vm659_vm13 = vcmp.eq.s32.totalorder %v1641_v45, %v621_v29 }
 0x174   : > { %v990_v10 = vsel %vm659_vm13, 1.0, %v1242_v55 }
 0x175   : > { %v707_v13 = vmul.f32 0.9, %v990_v10  ;;  %v740_v15 = vmul.f32 %v724_v47, %v594_v6  ;;  %v1133_v6 = vpop.eup %1132 }
 0x176   : > { %v627_v22 = vpop.permute.xlu0 %626  ;;  %v1135_v37 = vpop.eup %1134 }
 0x177   : > { %v723_v25 = vadd.f32 0.02, %v707_v13  ;;  %vm661_vm14 = vcmp.eq.s32.totalorder %v1641_v45, %v627_v22  ;;  %v766_v50 = vsel %vm412_vm0, %v740_v15, 0.0  ;;  %v598_v13 = vsub.f32 %v1585_v2, %v576_v12 }
 0x178   : > { %v992_v34 = vsel %vm661_vm14, 1.0, %v1242_v55  ;;  %767 = vadd.xlane.f32.xlu0 %v766_v50  ;;  %v580_v22 = vmul.f32 0.6931472, %v1133_v6  ;;  %v574_v4 = vmul.f32 0.6931472, %v1135_v37 }
 0x179   : > { %v709_v27 = vmul.f32 0.9, %v992_v34  ;;  %v739_v1 = vmul.f32 %v723_v25, %v593_v7 }
 0x17a   : > { %v630_v30 = vpop.permute.xlu0 %629  ;;  %v600_v50 = vsub.f32 %v1595_v60, %v580_v22 }
 0x17b   : > { %v725_v38 = vadd.f32 0.02, %v709_v27  ;;  %vm662_vm15 = vcmp.eq.s32.totalorder %v1641_v45, %v630_v30  ;;  %v763_v35 = vsel %vm412_vm0, %v739_v1, 0.0  ;;  %v1137_v30 = vpop.eup %1136 }
 0x17c   : > { %v993_v3 = vsel %vm662_vm15, 1.0, %v1242_v55  ;;  %764 = vadd.xlane.f32.xlu1 %v763_v35  ;;  %v1139_v35 = vpop.eup %1138 }
 0x17d   : > { %v710_v46 = vmul.f32 0.9, %v993_v3  ;;  %v741_v56 = vmul.f32 %v725_v38, %v595_v26  ;;  %v578_v26 = vmul.f32 0.6931472, %v1137_v30  ;;  %v1141_v51 = vpop.eup %1140 }
 0x17e   : > { %v636_v36 = vpop.permute.xlu0 %635 }
 0x17f   : > { %v726_v20 = vadd.f32 0.02, %v710_v46  ;;  %vm664_vm12 = vcmp.eq.s32.totalorder %v1641_v45, %v636_v36  ;;  %v769_v62 = vsel %vm412_vm0, %v741_v56, 0.0  ;;  %v584_v46 = vmul.f32 0.6931472, %v1139_v35 }
 0x180   : > { %v995_v0 = vsel %vm664_vm12, 1.0, %v1242_v55  ;;  %770 = vadd.xlane.f32.xlu1 %v769_v62  ;;  %v582_v62 = vmul.f32 0.6931472, %v1141_v51 }
 0x181   : > { %v712_v29 = vmul.f32 0.9, %v995_v0  ;;  %v742_v28 = vmul.f32 %v726_v20, %v596_v59  ;;  %v597_v20 = vsub.f32 %v1581_v39, %v574_v4 }
 0x182   : > { %v639_v47 = vpop.permute.xlu0 %638 }
 0x183   : > { %v728_v17 = vadd.f32 0.02, %v712_v29  ;;  %v772_v10 = vsel %vm412_vm0, %v742_v28, 0.0  ;;  %vm665_vm14 = vcmp.eq.s32.totalorder %v1641_v45, %v639_v47  ;;  %v599_v28 = vsub.f32 %v1590_v32, %v578_v26 }
 0x184   : > { %773 = vadd.xlane.f32.xlu0 %v772_v10  ;;  %v996_v60 = vsel %vm665_vm14, 1.0, %v1242_v55  ;;  %v601_v32 = vsub.f32 %v1600_v44, %v582_v62 }
 0x185   : > { %v744_v31 = vmul.f32 %v728_v17, %v598_v13  ;;  %v713_v52 = vmul.f32 0.9, %v996_v60  ;;  %v1143_v17 = vpop.eup %1142 }
 0x186   : > { %v642_v15 = vpop.permute.xlu0 %641 }
 0x187   : > { %vm666_vm13 = vcmp.eq.s32.totalorder %v1641_v45, %v642_v15  ;;  %v778_v7 = vsel %vm412_vm0, %v744_v31, 0.0  ;;  %v729_v56 = vadd.f32 0.02, %v713_v52  ;;  %v602_v15 = vsub.f32 %v1605_v54, %v584_v46 }
 0x188   : > { %v997_v19 = vsel %vm666_vm13, 1.0, %v1242_v55  ;;  %779 = vadd.xlane.f32.xlu0 %v778_v7 }
 0x189   : > { %v714_v40 = vmul.f32 0.9, %v997_v19  ;;  %v745_v31 = vmul.f32 %v729_v56, %v599_v28 }
 0x18a   : > { %v645_v2 = vpop.permute.xlu0 %644 }
 0x18b   : > { %v730_v25 = vadd.f32 0.02, %v714_v40  ;;  %vm667_vm15 = vcmp.eq.s32.totalorder %v1641_v45, %v645_v2  ;;  %v781_v2 = vsel %vm412_vm0, %v745_v31, 0.0 }
 0x18c   : > { %v998_v41 = vsel %vm667_vm15, 1.0, %v1242_v55 }
 0x18d   : > { %v746_v34 = vmul.f32 %v730_v25, %v600_v50  ;;  %v715_v36 = vmul.f32 0.9, %v998_v41  ;;  %v586_v25 = vmul.f32 0.6931472, %v1143_v17 }
 0x18e   : > { %v651_v38 = vpop.permute.xlu0 %650 }
 0x18f   : > { %v784_v27 = vsel %vm412_vm0, %v746_v34, 0.0  ;;  %vm669_vm13 = vcmp.eq.s32.totalorder %v1641_v45, %v651_v38  ;;  %v731_v10 = vadd.f32 0.02, %v715_v36 }
 0x190   : > { %785 = vadd.xlane.f32.xlu0 %v784_v27  ;;  %v1000_v0 = vsel %vm669_vm13, 1.0, %v1242_v55 }
 0x191   : > { %v717_v22 = vmul.f32 0.9, %v1000_v0 }
 0x193   : > { %v733_v54 = vadd.f32 0.02, %v717_v22 }
 0x19f   : > { %v556_v1 = vpop.xlane.xlu1 %555 }
 0x1a0   : > { %1144 = vlog2.f32 %v556_v1  ;;  %v747_v1 = vmul.f32 %v731_v10, %v601_v32 }
 0x1a2   : > { %v787_v52 = vsel %vm412_vm0, %v747_v1, 0.0 }
 0x1a3   : > { %v633_v9 = vpop.permute.xlu1 %632 }
 0x1a4   : > { %vm663_vm12 = vcmp.eq.s32.totalorder %v1641_v45, %v633_v9 }
 0x1a5   : > { %v994_v57 = vsel %vm663_vm12, 1.0, %v1242_v55 }
 0x1a6   : > { %v711_v3 = vmul.f32 0.9, %v994_v57 }
 0x1a7   : > { %v648_v59 = vpop.permute.xlu1 %647 }
 0x1a8   : > { %v727_v12 = vadd.f32 0.02, %v711_v3  ;;  %vm668_vm14 = vcmp.eq.s32.totalorder %v1641_v45, %v648_v59 }
 0x1a9   : > { %v999_v29 = vsel %vm668_vm14, 1.0, %v1242_v55 }
 0x1aa   : > { %v716_v47 = vmul.f32 0.9, %v999_v29  ;;  %v743_v6 = vmul.f32 %v727_v12, %v597_v20 }
 0x1ab   : > { %v654_v13 = vpop.permute.xlu1 %653 }
 0x1ac   : > { %v732_v7 = vadd.f32 0.02, %v716_v47  ;;  %vm670_vm15 = vcmp.eq.s32.totalorder %v1641_v45, %v654_v13  ;;  %v775_v39 = vsel %vm412_vm0, %v743_v6, 0.0 }
 0x1ad   : > { %v1145_v19 = vpop.eup %1144  ;;  %v1001_v40 = vsel %vm670_vm15, 1.0, %v1242_v55  ;;  %776 = vadd.xlane.f32.xlu1 %v775_v39  ;;  %v603_v55 = vsub.f32 %v1610_v61, %v586_v25 }
 0x1ae   : > { %v588_v50 = vmul.f32 0.6931472, %v1145_v19  ;;  %v718_v34 = vmul.f32 0.9, %v1001_v40  ;;  %v748_v27 = vmul.f32 %v732_v7, %v602_v15 }
 0x1af   : > { %v749_v38 = vmul.f32 %v733_v54, %v603_v55 }
 0x1b0   : > { %v734_v60 = vadd.f32 0.02, %v718_v34  ;;  %v790_v37 = vsel %vm412_vm0, %v748_v27, 0.0  ;;  %v604_v45 = vsub.f32 %v1627_v49, %v588_v50 }
 0x1b1   : > { %782 = vadd.xlane.f32.xlu1 %v781_v2  ;;  %791 = vadd.xlane.f32.xlu0 %v790_v37  ;;  %v793_v9 = vsel %vm412_vm0, %v749_v38, 0.0 }
 0x1b2   : > { %v750_v30 = vmul.f32 %v734_v60, %v604_v45 }
 0x1b4   : > { %v796_v44 = vsel %vm412_vm0, %v750_v30, 0.0  ;;  %vm1813_vm0 = vcmp.lt.s32.totalorder %v1465_v53, 300 }
 0x1b5   : > { %797 = vadd.xlane.f32.xlu0 %v796_v44  ;;  %788 = vadd.xlane.f32.xlu1 %v787_v52 }
 0x1b9   : > { %794 = vadd.xlane.f32.xlu1 %v793_v9 }
 0x1ed   : > { %v753_v35 = vpop.xlane.xlu0 %752 }
 0x1ee   : > { %v799_v49 = vsub.f32 0.0, %v753_v35 }
 0x1f0   : > { %v815_v3 = vmul.f32 0.0033333334, %v799_v49 }
 0x1f1   : > { %v756_v4 = vpop.xlane.xlu1 %755 }
 0x1f2   : > { %v759_v41 = vpop.xlane.xlu0 %758  ;;  %v800_v26 = vsub.f32 0.0, %v756_v4  ;;  %v831_v59 = vsel %vm348_vm1, %v815_v3, 0.0  ;;  %vm1814_vm1 = vcmp.lt.s32.totalorder %v1477_v58, 300 }
 0x1f3   : > { %v801_v46 = vsub.f32 0.0, %v759_v41 }
 0x1f4   : > { %v816_v57 = vmul.f32 0.0033333334, %v800_v26 }
 0x1f5   : > { %v817_v12 = vmul.f32 0.0033333334, %v801_v46 }
 0x1f6   : > { %v762_v51 = vpop.xlane.xlu0 %761  ;;  %v832_v56 = vsel %vm349_vm3, %v816_v57, 0.0  ;;  %vm1816_vm3 = vcmp.lt.s32.totalorder %v1501_v8, 300 }
 0x1f7   : > { %v802_v36 = vsub.f32 0.0, %v762_v51  ;;  %v847_v62 = vadd.f32 %v832_v56, %v831_v59  ;;  %v833_v28 = vsel %vm350_vm2, %v817_v12, 0.0  ;;  %vm1815_vm2 = vcmp.lt.s32.totalorder %v1489_v63, 300 }
 0x1f9   : > { %v818_v0 = vmul.f32 0.0033333334, %v802_v36  ;;  %v848_v6 = vadd.f32 %v847_v62, %v833_v28 }
 0x1fb   : > { %v834_v10 = vsel %vm351_vm4, %v818_v0, 0.0  ;;  %vm1817_vm4 = vcmp.lt.s32.totalorder %v1512_v11, 300 }
 0x1fc   : > { %v849_v15 = vadd.f32 %v848_v6, %v834_v10  ;;  %v868_v10 = vld [vmem:[%s1343_s23] sm:$0xff] }
 0x201   : > { %v768_v29 = vpop.xlane.xlu0 %767 }
 0x202   : > { %v804_v16 = vsub.f32 0.0, %v768_v29 }
 0x204   : > { %v820_v22 = vmul.f32 0.0033333334, %v804_v16 }
 0x205   : > { %v765_v61 = vpop.xlane.xlu1 %764 }
 0x206   : > { %v803_v20 = vsub.f32 0.0, %v765_v61  ;;  %v836_v14 = vsel %vm353_vm6, %v820_v22, 0.0 }
 0x208   : > { %v819_v47 = vmul.f32 0.0033333334, %v803_v20 }
 0x209   : > { %v771_v17 = vpop.xlane.xlu1 %770 }
 0x20a   : > { %v835_v5 = vsel %vm352_vm5, %v819_v47, 0.0  ;;  %v805_v31 = vsub.f32 0.0, %v771_v17 }
 0x20b   : > { %v850_v39 = vadd.f32 %v849_v15, %v835_v5 }
 0x20c   : > { %v821_v19 = vmul.f32 0.0033333334, %v805_v31 }
 0x20d   : > { %v774_v13 = vpop.xlane.xlu0 %773  ;;  %v851_v25 = vadd.f32 %v850_v39, %v836_v14 }
 0x20e   : > { %v806_v7 = vsub.f32 0.0, %v774_v13  ;;  %v837_v18 = vsel %vm354_vm7, %v821_v19, 0.0 }
 0x20f   : > { %v852_v1 = vadd.f32 %v851_v25, %v837_v18 }
 0x210   : > { %v822_v32 = vmul.f32 0.0033333334, %v806_v7 }
 0x211   : > { %v780_v40 = vpop.xlane.xlu0 %779 }
 0x212   : > { %v808_v50 = vsub.f32 0.0, %v780_v40  ;;  %v838_v21 = vsel %vm355_vm8, %v822_v32, 0.0 }
 0x213   : > { %v853_v45 = vadd.f32 %v852_v1, %v838_v21 }
 0x214   : > { %v824_v54 = vmul.f32 0.0033333334, %v808_v50 }
 0x216   : > { %v840_v52 = vsel %vm357_vm10, %v824_v54, 0.0 }
 0x219   : > { %v786_v34 = vpop.xlane.xlu0 %785 }
 0x21a   : > { %v810_v60 = vsub.f32 0.0, %v786_v34 }
 0x21c   : > { %v826_v38 = vmul.f32 0.0033333334, %v810_v60 }
 0x21e   : > { %v842_v42 = vsel %vm1813_vm0, %v826_v38, 0.0 }
 0x236   : > { %v777_v27 = vpop.xlane.xlu1 %776 }
 0x237   : > { %v807_v2 = vsub.f32 0.0, %v777_v27 }
 0x239   : > { %v823_v37 = vmul.f32 0.0033333334, %v807_v2 }
 0x23a   : > { %v783_v30 = vpop.xlane.xlu1 %782  ;;  %v792_v23 = vpop.xlane.xlu0 %791 }
 0x23b   : > { %v839_v55 = vsel %vm356_vm9, %v823_v37, 0.0  ;;  %v809_v44 = vsub.f32 0.0, %v783_v30  ;;  %v812_v33 = vsub.f32 0.0, %v792_v23 }
 0x23c   : > { %v854_v24 = vadd.f32 %v853_v45, %v839_v55 }
 0x23d   : > { %v825_v9 = vmul.f32 0.0033333334, %v809_v44  ;;  %v828_v51 = vmul.f32 0.0033333334, %v812_v33 }
 0x23e   : > { %v855_v35 = vadd.f32 %v854_v24, %v840_v52  ;;  %v789_v4 = vpop.xlane.xlu1 %788  ;;  %v798_v41 = vpop.xlane.xlu0 %797 }
 0x23f   : > { %v841_v26 = vsel %vm358_vm11, %v825_v9, 0.0  ;;  %v811_v49 = vsub.f32 0.0, %v789_v4  ;;  %v814_v46 = vsub.f32 0.0, %v798_v41  ;;  %v844_v48 = vsel %vm1815_vm2, %v828_v51, 0.0 }
 0x240   : > { %v856_v57 = vadd.f32 %v855_v35, %v841_v26 }
 0x241   : > { %v827_v3 = vmul.f32 0.0033333334, %v811_v49  ;;  %v830_v12 = vmul.f32 0.0033333334, %v814_v46 }
 0x242   : > { %v857_v61 = vadd.f32 %v856_v57, %v842_v42  ;;  %v795_v43 = vpop.xlane.xlu1 %794 }
 0x243   : > { %v843_v56 = vsel %vm1814_vm1, %v827_v3, 0.0  ;;  %v813_v36 = vsub.f32 0.0, %v795_v43  ;;  %v846_v58 = vsel %vm1817_vm4, %v830_v12, 0.0 }
 0x244   : > { %v858_v59 = vadd.f32 %v857_v61, %v843_v56 }
 0x245   : > { %v829_v20 = vmul.f32 0.0033333334, %v813_v36 }
 0x246   : > { %v859_v53 = vadd.f32 %v858_v59, %v844_v48 }
 0x247   : > { %v845_v62 = vsel %vm1816_vm3, %v829_v20, 0.0 }
 0x248   : > { %v860_v0 = vadd.f32 %v859_v53, %v845_v62 }
 0x24a   : > { %v861_v29 = vadd.f32 %v860_v0, %v846_v58 }
 0x24c   : > { %v862_v28 = vrot.slane %v861_v29, 4 }
 0x24e   : > { %v863_v47 = vadd.f32 %v862_v28, %v861_v29 }
 0x250   : > { %v864_v6 = vrot.slane %v863_v47, 2 }
 0x252   : > { %v865_v63 = vadd.f32 %v864_v6, %v863_v47 }
 0x254   : > { %v866_v17 = vrot.slane %v865_v63, 1 }
 0x256   : > { %v867_v16 = vadd.f32 %v866_v17, %v865_v63 }
 0x258   : > { %v869_v13 = vadd.f32 %v868_v10, %v867_v16 }
 0x25a   : > { %870 = vst [vmem:[%s1343_s23] sm:$0xff] %v869_v13 }
 0x25b   : > { %1159 = shalt.err (!%p1156_p8)
}
 0x25c   : > { %s1160_s7 = scalar_lea.hbm %s883_s30, 128  ;;  %s1164_s17 = scalar_lea.hbm %s1805_s2, 256 }
 0x25d   : > { %p1161_p10 = scmp.ne.s32.totalorder %s883_s30, %s1160_s7  ;;  %p1165_p13 = scmp.lt.s32.totalorder %s883_s30, %s1805_s2 }
 0x25e   : > { %p1166_p0 = scmp.lt.s32.totalorder %s1164_s17, %s1160_s7 }
 0x25f   : > { %p1162_p11 = pnand %p1161_p10, %p1308_p3 }
 0x260   : > { %p1167_p1 = por %p1166_p0, %p1165_p13 }
 0x261   : > { %p1163_p12 = pneg %p1162_p11 }
 0x263   : > { %p1168_p2 = pnand %p1167_p1, %p1163_p12 }
 0x265   : > { %1171 = shalt.err (!%p1168_p2)
}
 0x266   : > { %1006 = dma.vmem_to_hbm [thread:$0]  (%p1308_p3), %s886_s27, 128, %s883_s30, %s872_s3  }
 0x267 PF: > { %p1012_p4 = scmp.ge.s32.totalorder %s1238_s16, 2  ;;  %s897_s24 = sand.u32 1, %s1210_s9  }
 0x268   : > { %s898_s12 = scalar_lea.sflag [#allocation3], %s897_s24 }
 0x269   : > { %p1009_p5 = pnand %p1012_p4, %p1318_p9 }
 0x26b   : > { %p1010_p6 = pneg %p1009_p5 }
 0x26d   : > { %1205 = dma.done.wait (%p1010_p6), %s898_s12, 128  }
 0x26e   : > { %1207 = vsyncadd (%p1010_p6), %s898_s12, 4294967168  ;;  %s15_s16 = sadd.s32 1, %s1238_s16   ;;  %s1818_s9 = smov %s1214_s10 }
 0x26f   : > { %p12_p7 = scmp.ge.s32.totalorder %s15_s16, 6   ;;  %s1819_s10 = smov %s1218_s11 }
 0x270   : > { %s1820_s11 = smov %s1326_s25  ;;  %s1821_s12 = smov %s1230_s14 }
 0x271   : > { %s1822_s13 = smov %s1234_s15  ;;  %s1823_s14 = smov %s1826_s19 }
 0x272   : > { %s1824_s15 = smov %s1830_s20  ;;  %14 = sbr.rel (!%p12_p7) target bundleno = 5 (0x5), region = 70 }
 0x277   :  { %903 = vsyncpa [#allocation3], 1 }
 0x278   :  { %905 = vsyncpa [#allocation3 + $0x1], 1 }

</bundles_post_ra>
